<compile_context>
chip_gen: v5e
topology: v5e:2x2
jax: 0.10.0
libtpu: 0.0.40
codegen_flags: <defaults>
</compile_context>

<pallas_src>
import jax
import jax.numpy as jnp
from jax.experimental import pallas as pl
from jax.experimental.pallas import tpu as pltpu

IN0, OUT0 = 4, 3      # linear0: 4 -> 3
IN1, OUT1 = 3, 4      # linear1: 3 -> 4
F_IN, F_OUT = IN0, OUT1          # 4 -> 4 end-to-end
LANES = 128
GROUP = LANES // F_IN            # 32 samples packed per 128-lane row


def _fused_affine_kernel(x_ref, m_ref, b_ref, o_ref):
    """One grid step:  o_tile = x_tile @ M + bias   (all tiles lane-dense).

    x_ref : (TR, 128)   TR*32 samples, 4 features interleaved along lanes
    m_ref : (128, 128)  block-diagonal fused weight, resident across steps
    b_ref : (1, 128)    tiled fused bias,            resident across steps
    o_ref : (TR, 128)   same packed layout as the input
    """
    y = jnp.dot(x_ref[...], m_ref[...], preferred_element_type=jnp.float32)
    o_ref[...] = (y + b_ref[...].astype(jnp.float32)).astype(o_ref.dtype)


def dummy_module_forward(x, w0, b0, w1, b1, *, block_rows=2048):
    """x: [B, 4] -> [B, 4].  Weights are [in, out]; biases are [out]."""
    assert block_rows % 8 == 0, "row tile must be a multiple of 8 sublanes"
    B = x.shape[0]
    dtype = x.dtype

    # --- algebraic fusion of the two linears (tiny; hoist when weights are static)
    w_fused = (w0.astype(jnp.float32) @ w1.astype(jnp.float32))          # [4, 4]
    b_fused = (b0.astype(jnp.float32) @ w1.astype(jnp.float32)
               + b1.astype(jnp.float32))                                 # [4]

    # 128x128 block-diagonal weight (32 copies of the fused 4x4) + tiled bias.
    m128 = jnp.kron(jnp.eye(GROUP, dtype=jnp.float32), w_fused).astype(dtype)
    b128 = jnp.tile(b_fused, GROUP).reshape(1, LANES).astype(dtype)

    # --- pack 32 samples per 128-lane row (zero-copy row-major reshape).
    # Only pad if B is not a multiple of 32 (at most 31 extra rows).
    b_grp = pl.cdiv(B, GROUP) * GROUP
    if b_grp != B:
        x = jnp.pad(x, ((0, b_grp - B), (0, 0)))
    n_rows = b_grp // GROUP
    x_packed = x.reshape(n_rows, LANES)

    # --- row tiling: ragged last tile handled by Pallas partial blocks.
    tr = n_rows if n_rows <= block_rows else block_rows
    n_tiles = pl.cdiv(n_rows, tr)

    y_packed = pl.pallas_call(
        _fused_affine_kernel,
        out_shape=jax.ShapeDtypeStruct((n_rows, LANES), dtype),
        grid=(n_tiles,),
        in_specs=[
            pl.BlockSpec((tr, LANES), lambda i: (i, 0)),       # packed x tile
            pl.BlockSpec((LANES, LANES), lambda i: (0, 0)),    # fused W (resident)
            pl.BlockSpec((1, LANES), lambda i: (0, 0)),        # fused bias (resident)
        ],
        out_specs=pl.BlockSpec((tr, LANES), lambda i: (i, 0)),
        compiler_params=pltpu.CompilerParams(
            dimension_semantics=("parallel",)),
    )(x_packed, m128, b128)

    return y_packed.reshape(b_grp, F_OUT)[:B]                   # back to [B, 4]


def init_params(key, dtype=jnp.float32):
    """Deterministic init mimicking nn.Linear's U(-1/sqrt(fan_in), +).
    Weights kept in [in, out] form; biases as [out]."""
    k0w, k0b, k1w, k1b = jax.random.split(key, 4)
    bound0 = 1.0 / (IN0 ** 0.5)
    bound1 = 1.0 / (IN1 ** 0.5)
    w0 = jax.random.uniform(k0w, (IN0, OUT0), dtype, -bound0, bound0)
    b0 = jax.random.uniform(k0b, (OUT0,), dtype, -bound0, bound0)
    w1 = jax.random.uniform(k1w, (IN1, OUT1), dtype, -bound1, bound1)
    b1 = jax.random.uniform(k1b, (OUT1,), dtype, -bound1, bound1)
    return w0, b0, w1, b1


if __name__ == "__main__":
    key = jax.random.PRNGKey(0)
    kx1, kx2, kp = jax.random.split(key, 3)
    w0, b0, w1, b1 = init_params(kp, dtype=jnp.float32)

    def ref_fwd(x):
        # Reference: the original two sequential linears (PyTorch module semantics).
        return (x @ w0 + b0) @ w1 + b1

    # Case 1: ragged B (not a multiple of 32) -> exercises the small pack-pad path.
    B1 = 1000
    x1 = jax.random.normal(kx1, (B1, IN0), dtype=jnp.float32)
    fwd = jax.jit(dummy_module_forward)
    out1 = jax.block_until_ready(fwd(x1, w0, b0, w1, b1))
    assert out1.shape == (B1, OUT1), out1.shape
    assert jnp.allclose(out1, ref_fwd(x1), atol=1e-5, rtol=1e-5), "mismatch (case 1)"

    # Case 2: multi-tile grid with a ragged last row-tile (partial-block path).
    B2 = 4128                      # 129 packed rows; block_rows=64 -> tiles 64+64+1
    x2 = jax.random.normal(kx2, (B2, IN0), dtype=jnp.float32)
    fwd_small_tile = jax.jit(
        lambda x, a, b, c, d: dummy_module_forward(x, a, b, c, d, block_rows=64))
    out2 = jax.block_until_ready(fwd_small_tile(x2, w0, b0, w1, b1))
    assert out2.shape == (B2, OUT1), out2.shape
    assert jnp.allclose(out2, ref_fwd(x2), atol=1e-5, rtol=1e-5), "mismatch (case 2)"

    print("KERNEL_OK")
</pallas_src>

<mosaic_0001>
module attributes {stable_mosaic.version = 11 : i64} {
  func.func @_fused_affine_kernel(%arg0: i32, %arg1: memref<32x128xf32, #tpu.memory_space<vmem>>, %arg2: memref<128x128xf32, #tpu.memory_space<vmem>>, %arg3: memref<1x128xf32, #tpu.memory_space<vmem>>, %arg4: memref<32x128xf32, #tpu.memory_space<vmem>>) attributes {dimension_semantics = [#tpu.dimension_semantics<parallel>], iteration_bounds = array<i64: 1>, scalar_prefetch = 0 : i64, scratch_operands = 0 : i64, tpu.core_type = #tpu.core_type<tc>, window_params = [{transform_indices = @transform_0, window_bounds = array<i64: 32, 128>}, {pipeline_mode = #tpu.pipeline_mode<synchronous>, transform_indices = @transform_1, window_bounds = array<i64: 128, 128>}, {pipeline_mode = #tpu.pipeline_mode<synchronous>, transform_indices = @transform_2, window_bounds = array<i64: 1, 128>}, {transform_indices = @transform_3, window_bounds = array<i64: 32, 128>}]} {
    %c0 = arith.constant 0 : index
    %c0_0 = arith.constant 0 : index
    %0 = vector.load %arg1[%c0, %c0_0] : memref<32x128xf32, #tpu.memory_space<vmem>>, vector<32x128xf32>
    %c0_1 = arith.constant 0 : index
    %c0_2 = arith.constant 0 : index
    %1 = vector.load %arg2[%c0_1, %c0_2] : memref<128x128xf32, #tpu.memory_space<vmem>>, vector<128x128xf32>
    %cst = arith.constant dense<0.000000e+00> : vector<32x128xf32>
    %2 = tpu.matmul %0, %1, %cst {dimension_numbers = #tpu.dot_dimension_numbers<[1], [0], [0], [1], [0, 0, 1, 1], [], []>} : vector<32x128xf32>, vector<128x128xf32>, vector<32x128xf32> -> vector<32x128xf32>
    %c0_3 = arith.constant 0 : index
    %c0_4 = arith.constant 0 : index
    %3 = vector.load %arg3[%c0_3, %c0_4] : memref<1x128xf32, #tpu.memory_space<vmem>>, vector<1x128xf32>
    %4 = vector.broadcast %3 : vector<1x128xf32> to vector<32x128xf32>
    %5 = arith.addf %2, %4 : vector<32x128xf32>
    %c0_5 = arith.constant 0 : index
    %c0_6 = arith.constant 0 : index
    %6 = vector.load %arg4[%c0_5, %c0_6] : memref<32x128xf32, #tpu.memory_space<vmem>>, vector<32x128xf32>
    tpu.vector_store %arg4[%c0_5, %c0_6], %5 {strides = array<i32>} : memref<32x128xf32, #tpu.memory_space<vmem>>, vector<32x128xf32>,
    return
  }
  func.func @transform_0(%arg0: i32) -> (i32, i32) {
    %c0_i32 = arith.constant 0 : i32
    %c0_i32_0 = arith.constant 0 : i32
    return %arg0, %c0_i32 : i32, i32
  }
  func.func @transform_1(%arg0: i32) -> (i32, i32) {
    %c0_i32 = arith.constant 0 : i32
    %c0_i32_0 = arith.constant 0 : i32
    %c0_i32_1 = arith.constant 0 : i32
    return %c0_i32, %c0_i32_0 : i32, i32
  }
  func.func @transform_2(%arg0: i32) -> (i32, i32) {
    %c0_i32 = arith.constant 0 : i32
    %c0_i32_0 = arith.constant 0 : i32
    %c0_i32_1 = arith.constant 0 : i32
    return %c0_i32, %c0_i32_0 : i32, i32
  }
  func.func @transform_3(%arg0: i32) -> (i32, i32) {
    %c0_i32 = arith.constant 0 : i32
    %c0_i32_0 = arith.constant 0 : i32
    return %arg0, %c0_i32 : i32, i32
  }
}

</mosaic_0001>

<bundles_post_ra>
// kernel: tile.8
= control target key start
LH: loop header
LB: loop body
LE: loop exit
PB: predicated region body
PF: predicated region fallthrough
CT: control target
= control target key end

     0   :  { %s40_s0 = inlined_call_operand.vmem [shape: f32[4], index: 0, kind: input, shape index: {}]   ;;  %s41_s1 = inlined_call_operand.vmem [shape: f32[32,4], index: 1, kind: output, shape index: {}]  }
   0x1   :  { %v4_v0 = vld [vmem:[%s40_s0] ss:$0 sm:$0xff] }
   0x2   :  { %5 = vst [vmem:[%s41_s1] sm:$0xff] %v4_v0 }
   0x3   :  { %12 = vst [vmem:[%s41_s1 + $0x8] sm:$0xff] %v4_v0 }
   0x4   :  { %13 = vst [vmem:[%s41_s1 + $0x10] sm:$0xff] %v4_v0 }
   0x5   :  { %14 = vst [vmem:[%s41_s1 + $0x18] sm:$0xff] %v4_v0 }

// kernel: tile.9
= control target key start
LH: loop header
LB: loop body
LE: loop exit
PB: predicated region body
PF: predicated region fallthrough
CT: control target
= control target key end

     0   :  { %s259_s10 = smov 124   ;;  %s260_s11 = smov 116   ;;  %vm3_vm0 = vcmask 31744   ;;  %vm9_vm1 = vcmask 1048544   ;;  %vm15_vm2 = vcmask 1015744   ;;  %vm21_vm3 = vcmask 982944   ;;  %s399_s0 = inlined_call_operand.vmem [shape: f32[32,4], index: 0, kind: input, shape index: {}]   ;;  %s400_s1 = inlined_call_operand.vmem [shape: f32[1,128], index: 1, kind: output, shape index: {}]  }
   0x1   :  { %v197_v0 = vld [vmem:[%s399_s0 + $0x1f] sm:$0x1]   ;;  %v199_v1 = vld [vmem:[%s399_s0 + $0x1d] sm:$0x1]   ;;  %v201_v2 = vld [vmem:[%s399_s0 + $0x1b] sm:$0x1]  }
   0x2   :  { %7 = vrot.lane.b32.xlu0 %v197_v0, %s259_s10  ;;  %19 = vrot.lane.b32.xlu1 %v199_v1, %s260_s11  ;;  %s261_s14 = smov 108   ;;  %v198_v3 = vld [vmem:[%s399_s0 + $0x1e] sm:$0x1]   ;;  %v200_v4 = vld [vmem:[%s399_s0 + $0x1c] sm:$0x1]   ;;  %s262_s19 = smov 120  }
   0x3   :  { %31 = vrot.lane.b32.xlu2 %v201_v2, %s261_s14  ;;  %s263_s20 = smov 112   ;;  %v202_v5 = vld [vmem:[%s399_s0 + $0x1a] sm:$0x1]   ;;  %s264_s23 = smov 104   ;;  %v203_v6 = vld [vmem:[%s399_s0 + $0x19] sm:$0x1]  }
   0x4   :  { %v204_v7 = vld [vmem:[%s399_s0 + $0x18] sm:$0x1]   ;;  %s265_s28 = smov 100   ;;  %s266_s29 = smov 96   ;;  %v205_v8 = vld [vmem:[%s399_s0 + $0x17] sm:$0x1]  }
   0x5   :  { %s267_s3 = smov 92   ;;  %v206_v9 = vld [vmem:[%s399_s0 + $0x16] sm:$0x1]   ;;  %v207_v10 = vld [vmem:[%s399_s0 + $0x15] sm:$0x1]   ;;  %s268_s8 = smov 88  }
   0x6   :  { %s269_s9 = smov 84   ;;  %v208_v11 = vld [vmem:[%s399_s0 + $0x14] sm:$0x1]   ;;  %s270_s12 = smov 80   ;;  %v209_v12 = vld [vmem:[%s399_s0 + $0x13] sm:$0x1]  }
   0x7   :  { %v210_v13 = vld [vmem:[%s399_s0 + $0x12] sm:$0x1]   ;;  %s271_s17 = smov 76   ;;  %s272_s18 = smov 72   ;;  %v211_v14 = vld [vmem:[%s399_s0 + $0x11] sm:$0x1]  }
   0x8   :  { %s273_s21 = smov 68   ;;  %v212_v15 = vld [vmem:[%s399_s0 + $0x10] sm:$0x1]   ;;  %v213_v16 = vld [vmem:[%s399_s0 + $0xf] sm:$0x1]   ;;  %s274_s26 = smov 64  }
   0x9   :  { %s275_s27 = smov 60   ;;  %v214_v17 = vld [vmem:[%s399_s0 + $0xe] sm:$0x1]   ;;  %s276_s30 = smov 56   ;;  %v215_v18 = vld [vmem:[%s399_s0 + $0xd] sm:$0x1]  }
   0xa   :  { %13 = vrot.lane.b32.xlu0 %v198_v3, %s262_s19  ;;  %25 = vrot.lane.b32.xlu1 %v200_v4, %s263_s20  ;;  %v216_v19 = vld [vmem:[%s399_s0 + $0xc] sm:$0x1]   ;;  %s277_s6 = smov 52   ;;  %s278_s7 = smov 48   ;;  %v217_v20 = vld [vmem:[%s399_s0 + $0xb] sm:$0x1]  }
   0xb   :  { %37 = vrot.lane.b32.xlu2 %v202_v5, %s264_s23  ;;  %s279_s10 = smov 44   ;;  %v218_v21 = vld [vmem:[%s399_s0 + $0xa] sm:$0x1]   ;;  %v219_v22 = vld [vmem:[%s399_s0 + $0x9] sm:$0x1]   ;;  %s280_s15 = smov 40  }
   0xc   :  { %s281_s16 = smov 36   ;;  %v220_v23 = vld [vmem:[%s399_s0 + $0x8] sm:$0x1]   ;;  %s282_s19 = smov 32   ;;  %v221_v24 = vld [vmem:[%s399_s0 + $0x7] sm:$0x1]  }
   0xd   :  { %v222_v25 = vld [vmem:[%s399_s0 + $0x6] sm:$0x1]   ;;  %s283_s24 = smov 28   ;;  %s284_s25 = smov 24   ;;  %v223_v26 = vld [vmem:[%s399_s0 + $0x5] sm:$0x1]  }
   0xe   :  { %v224_v27 = vld [vmem:[%s399_s0 + $0x4] sm:$0x1]   ;;  %v225_v28 = vld [vmem:[%s399_s0 + $0x3] sm:$0x1]   ;;  %s286_s4 = smov 16   ;;  %s287_s5 = smov 12  }
   0xf   :  { %v226_v29 = vld [vmem:[%s399_s0 + $0x2] sm:$0x1]   ;;  %v227_v30 = vld [vmem:[%s399_s0 + $0x1] sm:$0x1]   ;;  %s289_s11 = smov 4   ;;  %vm27_vm4 = vcmask 950144  }
  0x10   :  { %v2_v31 = vld [vmem:[%s399_s0] sm:$0x1]   ;;  %vm33_vm5 = vcmask 917344   ;;  %vm39_vm6 = vcmask 884544   ;;  %vm45_vm7 = vcmask 851744   ;;  %vm51_vm8 = vcmask 818944  }
  0x11   :  { %4 = vst.msk [vmem:[#allocation0] sm:$0x1] %vm3_vm0, %v2_v31   ;;  %vm57_vm9 = vcmask 786144   ;;  %vm63_vm10 = vcmask 753344   ;;  %vm69_vm11 = vcmask 720544   ;;  %vm75_vm12 = vcmask 687744  }
  0x12   :  { %43 = vrot.lane.b32.xlu0 %v203_v6, %s265_s28  ;;  %49 = vrot.lane.b32.xlu1 %v204_v7, %s266_s29  ;;  %s285_s28 = smov 20   ;;  %vm81_vm13 = vcmask 654944   ;;  %vm87_vm14 = vcmask 622144   ;;  %vm93_vm15 = vcmask 589344   ;;  %vm99_vm0 = vcmask 556544  }
  0x13   :  { %55 = vrot.lane.b32.xlu2 %v205_v8, %s267_s3 }
  0x1a   :  { %61 = vrot.lane.b32.xlu0 %v206_v9, %s268_s8  ;;  %67 = vrot.lane.b32.xlu1 %v207_v10, %s269_s9  ;;  %s288_s8 = smov 8  }
  0x1b   :  { %73 = vrot.lane.b32.xlu2 %v208_v11, %s270_s12 }
  0x22   :  { %79 = vrot.lane.b32.xlu0 %v209_v12, %s271_s17  ;;  %85 = vrot.lane.b32.xlu1 %v210_v13, %s272_s18 }
  0x23   :  { %91 = vrot.lane.b32.xlu2 %v211_v14, %s273_s21 }
  0x2a   :  { %97 = vrot.lane.b32.xlu0 %v212_v15, %s274_s26  ;;  %103 = vrot.lane.b32.xlu1 %v213_v16, %s275_s27 }
  0x2b   :  { %109 = vrot.lane.b32.xlu2 %v214_v17, %s276_s30 }
  0x32   :  { %115 = vrot.lane.b32.xlu0 %v215_v18, %s277_s6  ;;  %121 = vrot.lane.b32.xlu1 %v216_v19, %s278_s7 }
  0x33   :  { %127 = vrot.lane.b32.xlu2 %v217_v20, %s279_s10 }
  0x3a   :  { %133 = vrot.lane.b32.xlu0 %v218_v21, %s280_s15  ;;  %139 = vrot.lane.b32.xlu1 %v219_v22, %s281_s16 }
  0x3b   :  { %145 = vrot.lane.b32.xlu2 %v220_v23, %s282_s19 }
  0x42   :  { %151 = vrot.lane.b32.xlu0 %v221_v24, %s283_s24  ;;  %157 = vrot.lane.b32.xlu1 %v222_v25, %s284_s25 }
  0x43   :  { %163 = vrot.lane.b32.xlu2 %v223_v26, %s285_s28 }
  0x4a   :  { %169 = vrot.lane.b32.xlu0 %v224_v27, %s286_s4  ;;  %175 = vrot.lane.b32.xlu1 %v225_v28, %s287_s5 }
  0x4b   :  { %181 = vrot.lane.b32.xlu2 %v226_v29, %s288_s8 }
  0x52   :  { %187 = vrot.lane.b32.xlu0 %v227_v30, %s289_s11 }
  0x5d   :  { %v32_v32 = vpop.permute.xlu2 %31  }
  0x65   :  { %v38_v33 = vpop.permute.xlu2 %37  }
  0x6d   :  { %v56_v34 = vpop.permute.xlu2 %55  }
  0x74   :  { %v8_v35 = vpop.permute.xlu0 %7   ;;  %v20_v36 = vpop.permute.xlu1 %19  }
  0x75   :  { %10 = vst.msk [vmem:[#allocation0] sm:$0x1] %vm9_vm1, %v8_v35   ;;  %v74_v37 = vpop.permute.xlu2 %73   ;;  %vm105_vm1 = vcmask 523744  }
  0x7c   :  { %v14_v38 = vpop.permute.xlu0 %13   ;;  %v26_v39 = vpop.permute.xlu1 %25  }
  0x7d   :  { %16 = vst.msk [vmem:[#allocation0] sm:$0x1] %vm15_vm2, %v14_v38   ;;  %v92_v40 = vpop.permute.xlu2 %91   ;;  %vm111_vm2 = vcmask 490944  }
  0x7e   :  { %22 = vst.msk [vmem:[#allocation0] sm:$0x1] %vm21_vm3, %v20_v36   ;;  %vm117_vm3 = vcmask 458144  }
  0x7f   :  { %28 = vst.msk [vmem:[#allocation0] sm:$0x1] %vm27_vm4, %v26_v39   ;;  %vm123_vm4 = vcmask 425344  }
  0x80   :  { %34 = vst.msk [vmem:[#allocation0] sm:$0x1] %vm33_vm5, %v32_v32   ;;  %vm129_vm5 = vcmask 392544  }
  0x81   :  { %40 = vst.msk [vmem:[#allocation0] sm:$0x1] %vm39_vm6, %v38_v33   ;;  %vm135_vm6 = vcmask 359744  }
  0x84   :  { %v44_v41 = vpop.permute.xlu0 %43   ;;  %v50_v42 = vpop.permute.xlu1 %49  }
  0x85   :  { %46 = vst.msk [vmem:[#allocation0] sm:$0x1] %vm45_vm7, %v44_v41   ;;  %v110_v43 = vpop.permute.xlu2 %109   ;;  %vm141_vm7 = vcmask 326944  }
  0x86   :  { %52 = vst.msk [vmem:[#allocation0] sm:$0x1] %vm51_vm8, %v50_v42   ;;  %vm147_vm8 = vcmask 294144  }
  0x87   :  { %58 = vst.msk [vmem:[#allocation0] sm:$0x1] %vm57_vm9, %v56_v34   ;;  %vm153_vm9 = vcmask 261344  }
  0x8c   :  { %v62_v44 = vpop.permute.xlu0 %61   ;;  %v68_v45 = vpop.permute.xlu1 %67  }
  0x8d   :  { %64 = vst.msk [vmem:[#allocation0] sm:$0x1] %vm63_vm10, %v62_v44   ;;  %v128_v46 = vpop.permute.xlu2 %127   ;;  %vm159_vm10 = vcmask 228544  }
  0x8e   :  { %70 = vst.msk [vmem:[#allocation0] sm:$0x1] %vm69_vm11, %v68_v45   ;;  %vm165_vm11 = vcmask 195744  }
  0x8f   :  { %76 = vst.msk [vmem:[#allocation0] sm:$0x1] %vm75_vm12, %v74_v37   ;;  %vm171_vm12 = vcmask 162944  }
  0x94   :  { %v80_v47 = vpop.permute.xlu0 %79   ;;  %v86_v48 = vpop.permute.xlu1 %85  }
  0x95   :  { %82 = vst.msk [vmem:[#allocation0] sm:$0x1] %vm81_vm13, %v80_v47   ;;  %v146_v49 = vpop.permute.xlu2 %145   ;;  %vm177_vm13 = vcmask 130144  }
  0x96   :  { %88 = vst.msk [vmem:[#allocation0] sm:$0x1] %vm87_vm14, %v86_v48   ;;  %vm183_vm14 = vcmask 97344  }
  0x97   :  { %94 = vst.msk [vmem:[#allocation0] sm:$0x1] %vm93_vm15, %v92_v40   ;;  %vm189_vm15 = vcmask 64544  }
  0x9c   :  { %v98_v50 = vpop.permute.xlu0 %97   ;;  %v104_v51 = vpop.permute.xlu1 %103  }
  0x9d   :  { %100 = vst.msk [vmem:[#allocation0] sm:$0x1] %vm99_vm0, %v98_v50   ;;  %v164_v52 = vpop.permute.xlu2 %163  }
  0x9e   :  { %106 = vst.msk [vmem:[#allocation0] sm:$0x1] %vm105_vm1, %v104_v51  }
  0x9f   :  { %112 = vst.msk [vmem:[#allocation0] sm:$0x1] %vm111_vm2, %v110_v43  }
  0xa4   :  { %v116_v53 = vpop.permute.xlu0 %115   ;;  %v122_v54 = vpop.permute.xlu1 %121  }
  0xa5   :  { %118 = vst.msk [vmem:[#allocation0] sm:$0x1] %vm117_vm3, %v116_v53   ;;  %v182_v55 = vpop.permute.xlu2 %181  }
  0xa6   :  { %124 = vst.msk [vmem:[#allocation0] sm:$0x1] %vm123_vm4, %v122_v54  }
  0xa7   :  { %130 = vst.msk [vmem:[#allocation0] sm:$0x1] %vm129_vm5, %v128_v46  }
  0xac   :  { %v134_v56 = vpop.permute.xlu0 %133   ;;  %v140_v57 = vpop.permute.xlu1 %139  }
  0xad   :  { %136 = vst.msk [vmem:[#allocation0] sm:$0x1] %vm135_vm6, %v134_v56  }
  0xae   :  { %142 = vst.msk [vmem:[#allocation0] sm:$0x1] %vm141_vm7, %v140_v57  }
  0xaf   :  { %148 = vst.msk [vmem:[#allocation0] sm:$0x1] %vm147_vm8, %v146_v49  }
  0xb4   :  { %v152_v58 = vpop.permute.xlu0 %151   ;;  %v158_v59 = vpop.permute.xlu1 %157  }
  0xb5   :  { %154 = vst.msk [vmem:[#allocation0] sm:$0x1] %vm153_vm9, %v152_v58  }
  0xb6   :  { %160 = vst.msk [vmem:[#allocation0] sm:$0x1] %vm159_vm10, %v158_v59  }
  0xb7   :  { %166 = vst.msk [vmem:[#allocation0] sm:$0x1] %vm165_vm11, %v164_v52  }
  0xbc   :  { %v170_v60 = vpop.permute.xlu0 %169   ;;  %v176_v61 = vpop.permute.xlu1 %175  }
  0xbd   :  { %172 = vst.msk [vmem:[#allocation0] sm:$0x1] %vm171_vm12, %v170_v60  }
  0xbe   :  { %178 = vst.msk [vmem:[#allocation0] sm:$0x1] %vm177_vm13, %v176_v61  }
  0xbf   :  { %184 = vst.msk [vmem:[#allocation0] sm:$0x1] %vm183_vm14, %v182_v55  }
  0xc4   :  { %v188_v62 = vpop.permute.xlu0 %187  }
  0xc5   :  { %190 = vst.msk [vmem:[#allocation0] sm:$0x1] %vm189_vm15, %v188_v62  }
  0xcc   :  { %v193_v63 = vld [vmem:[#allocation0] sm:$0x1] }
  0xcd   :  { %196 = vst [vmem:[%s400_s1] sm:$0x1] %v193_v63 }

// kernel: dummy_module_forward.1
= control target key start
LH: loop header
LB: loop body
LE: loop exit
PB: predicated region body
PF: predicated region fallthrough
CT: control target
= control target key end

     0   :  { %s219_s1 = inlined_call_operand.vmem [shape: f32[128,128], index: 1, kind: input, shape index: {}]   ;;  %s220_s2 = inlined_call_operand.vmem [shape: f32[1,128], index: 2, kind: input, shape index: {}]   ;;  %s221_s0 = inlined_call_operand.vmem [shape: f32[32,128], index: 0, kind: input, shape index: {}]   ;;  %s222_s3 = inlined_call_operand.vmem [shape: f32[32,128], index: 3, kind: output, shape index: {}]  }
   0x1   :  { %v33_v0 = vld [vmem:[%s219_s1 + $0x78] sm:$0xff]  ;;  %v32_v1 = vld [vmem:[%s219_s1 + $0x70] sm:$0xff]  ;;  %v31_v2 = vld [vmem:[%s219_s1 + $0x68] sm:$0xff] }
   0x2   :  { %76 = vmatpush.msra.mxu2 %v33_v0  ;;  %77 = vmatpush.msra.mxu3 %v33_v0  ;;  %v30_v3 = vld [vmem:[%s219_s1 + $0x60] sm:$0xff]  ;;  %v29_v4 = vld [vmem:[%s219_s1 + $0x58] sm:$0xff]  ;;  %v28_v5 = vld [vmem:[%s219_s1 + $0x50] sm:$0xff] }
   0x3   :  { %38 = vmatpush.msra.mxu0 %v33_v0  ;;  %75 = vmatpush.msra.mxu1 %v33_v0  ;;  %v27_v6 = vld [vmem:[%s219_s1 + $0x48] sm:$0xff]  ;;  %v26_v7 = vld [vmem:[%s219_s1 + $0x40] sm:$0xff]  ;;  %v25_v8 = vld [vmem:[%s219_s1 + $0x38] sm:$0xff] }
   0x4   :  { %79 = vmatpush.msra.mxu2 %v32_v1  ;;  %80 = vmatpush.msra.mxu3 %v32_v1  ;;  %v24_v9 = vld [vmem:[%s219_s1 + $0x30] sm:$0xff]  ;;  %v23_v10 = vld [vmem:[%s219_s1 + $0x28] sm:$0xff]  ;;  %v22_v11 = vld [vmem:[%s219_s1 + $0x20] sm:$0xff] }
   0x5   :  { %39 = vmatpush.msra.mxu0 %v32_v1  ;;  %78 = vmatpush.msra.mxu1 %v32_v1  ;;  %v21_v12 = vld [vmem:[%s219_s1 + $0x18] sm:$0xff]  ;;  %v20_v13 = vld [vmem:[%s219_s1 + $0x10] sm:$0xff]  ;;  %v19_v14 = vld [vmem:[%s219_s1 + $0x8] sm:$0xff] }
   0x6   :  { %82 = vmatpush.msra.mxu2 %v31_v2  ;;  %83 = vmatpush.msra.mxu3 %v31_v2  ;;  %v18_v15 = vld [vmem:[%s219_s1] sm:$0xff]  ;;  %v16_v16 = vld [vmem:[%s221_s0 + $0x10] sm:$0xff]  ;;  %v17_v17 = vld [vmem:[%s221_s0 + $0x18] sm:$0xff] }
   0x7   :  { %40 = vmatpush.msra.mxu0 %v31_v2  ;;  %81 = vmatpush.msra.mxu1 %v31_v2  ;;  %v14_v18 = vld [vmem:[%s221_s0] sm:$0xff]  ;;  %v15_v19 = vld [vmem:[%s221_s0 + $0x8] sm:$0xff] }
   0x8   :  { %85 = vmatpush.msra.mxu2 %v30_v3  ;;  %86 = vmatpush.msra.mxu3 %v30_v3  ;;  %v123_v20 = vld [vmem:[%s220_s2] ss:$0 sm:$0xff] }
   0x9   :  { %41 = vmatpush.msra.mxu0 %v30_v3  ;;  %84 = vmatpush.msra.mxu1 %v30_v3 }
   0xa   :  { %88 = vmatpush.msra.mxu2 %v29_v4  ;;  %89 = vmatpush.msra.mxu3 %v29_v4 }
   0xb   :  { %42 = vmatpush.msra.mxu0 %v29_v4  ;;  %87 = vmatpush.msra.mxu1 %v29_v4 }
   0xc   :  { %91 = vmatpush.msra.mxu2 %v28_v5  ;;  %92 = vmatpush.msra.mxu3 %v28_v5 }
   0xd   :  { %43 = vmatpush.msra.mxu0 %v28_v5  ;;  %90 = vmatpush.msra.mxu1 %v28_v5 }
   0xe   :  { %94 = vmatpush.msra.mxu2 %v27_v6  ;;  %95 = vmatpush.msra.mxu3 %v27_v6 }
   0xf   :  { %44 = vmatpush.msra.mxu0 %v27_v6  ;;  %93 = vmatpush.msra.mxu1 %v27_v6 }
  0x10   :  { %97 = vmatpush.msra.mxu2 %v26_v7  ;;  %98 = vmatpush.msra.mxu3 %v26_v7 }
  0x11   :  { %45 = vmatpush.msra.mxu0 %v26_v7  ;;  %96 = vmatpush.msra.mxu1 %v26_v7 }
  0x12   :  { %100 = vmatpush.msra.mxu2 %v25_v8  ;;  %101 = vmatpush.msra.mxu3 %v25_v8 }
  0x13   :  { %46 = vmatpush.msra.mxu0 %v25_v8  ;;  %99 = vmatpush.msra.mxu1 %v25_v8 }
  0x14   :  { %103 = vmatpush.msra.mxu2 %v24_v9  ;;  %104 = vmatpush.msra.mxu3 %v24_v9 }
  0x15   :  { %47 = vmatpush.msra.mxu0 %v24_v9  ;;  %102 = vmatpush.msra.mxu1 %v24_v9 }
  0x16   :  { %106 = vmatpush.msra.mxu2 %v23_v10  ;;  %107 = vmatpush.msra.mxu3 %v23_v10 }
  0x17   :  { %48 = vmatpush.msra.mxu0 %v23_v10  ;;  %105 = vmatpush.msra.mxu1 %v23_v10 }
  0x18   :  { %109 = vmatpush.msra.mxu2 %v22_v11  ;;  %110 = vmatpush.msra.mxu3 %v22_v11 }
  0x19   :  { %49 = vmatpush.msra.mxu0 %v22_v11  ;;  %108 = vmatpush.msra.mxu1 %v22_v11 }
  0x1a   :  { %112 = vmatpush.msra.mxu2 %v21_v12  ;;  %113 = vmatpush.msra.mxu3 %v21_v12 }
  0x1b   :  { %50 = vmatpush.msra.mxu0 %v21_v12  ;;  %111 = vmatpush.msra.mxu1 %v21_v12 }
  0x1c   :  { %115 = vmatpush.msra.mxu2 %v20_v13  ;;  %116 = vmatpush.msra.mxu3 %v20_v13 }
  0x1d   :  { %51 = vmatpush.msra.mxu0 %v20_v13  ;;  %114 = vmatpush.msra.mxu1 %v20_v13 }
  0x1e   :  { %118 = vmatpush.msra.mxu2 %v19_v14  ;;  %119 = vmatpush.msra.mxu3 %v19_v14 }
  0x1f   :  { %52 = vmatpush.msra.mxu0 %v19_v14  ;;  %117 = vmatpush.msra.mxu1 %v19_v14 }
  0x20   :  { %121 = vmatpush.msra.mxu2 %v18_v15  ;;  %122 = vmatpush.msra.mxu3 %v18_v15 }
  0x21   :  { %60 = vmatmul.f32.vlgmr.msra.gmra.mxu2 %v16_v16  ;;  %63 = vmatmul.f32.vlgmr.msra.gmra.mxu3 %v17_v17 }
  0x22   :  { %53 = vmatpush.msra.mxu0 %v18_v15  ;;  %120 = vmatpush.msra.mxu1 %v18_v15 }
  0x23   :  { %54 = vmatmul.f32.vlgmr.msra.gmra.mxu0 %v14_v18  ;;  %57 = vmatmul.f32.vlgmr.msra.gmra.mxu1 %v15_v19 }
  0xa0   :  { %v55_v21 = vpop.f32.mrf.mxu0  ;;  %v58_v22 = vpop.f32.mrf.mxu1 }
  0xa1   :  { %v56_v23 = vadd.f32 %v123_v20, %v55_v21  ;;  %v59_v24 = vadd.f32 %v123_v20, %v58_v22 }
  0xa3   :  { %67 = vst [vmem:[%s222_s3] sm:$0xff] %v56_v23 }
  0xa4   :  { %68 = vst [vmem:[%s222_s3 + $0x8] sm:$0xff] %v59_v24  ;;  %v61_v25 = vpop.f32.mrf.mxu2  ;;  %v64_v26 = vpop.f32.mrf.mxu3 }
  0xa5   :  { %v62_v27 = vadd.f32 %v123_v20, %v61_v25  ;;  %v65_v28 = vadd.f32 %v123_v20, %v64_v26 }
  0xa7   :  { %69 = vst [vmem:[%s222_s3 + $0x10] sm:$0xff] %v62_v27 }
  0xa8   :  { %70 = vst [vmem:[%s222_s3 + $0x18] sm:$0xff] %v65_v28 }

</bundles_post_ra>
